<compile_context>
chip_gen: v7x
topology: tpu7x:2x2x1
jax: 0.10.0
libtpu: 0.0.40
codegen_flags: <defaults>
</compile_context>

<pallas_src>
import jax
import jax.numpy as jnp
from jax.experimental import pallas as pl
from jax.experimental.pallas import tpu as pltpu

LN_EPS = 1e-5                          # nn.LayerNorm default
_VMEM_LIMIT = 32 * 1024 * 1024         # safe on v7x (64 MiB) and v5e/v6e (128 MiB)
_TILE_VMEM_BUDGET = 20 * 1024 * 1024   # block+scratch budget used to cap tiles


def _round_up(x, m):
    return ((x + m - 1) // m) * m


def _cdiv(a, b):
    return (a + b - 1) // b


# ---------------------------------------------------------------------------
# Kernels
# ---------------------------------------------------------------------------
def _layernorm_kernel(x_ref, g_ref, b_ref, o_ref):
    # x_ref: (tile_rows, D) ; g_ref/b_ref: (1, D).  All math in f32 (v5e VPU).
    x = x_ref[...].astype(jnp.float32)
    mean = jnp.mean(x, axis=-1, keepdims=True)
    xc = x - mean
    var = jnp.mean(xc * xc, axis=-1, keepdims=True)       # biased, like PyTorch
    inv = jax.lax.rsqrt(var + LN_EPS)
    g = g_ref[...].astype(jnp.float32)
    beta = b_ref[...].astype(jnp.float32)
    o_ref[...] = ((xc * inv) * g + beta).astype(o_ref.dtype)


def _prenorm_linear_kernel(x_ref, w_ref, b_ref, o_ref, xn_ref):
    # Fused LayerNorm -> Linear.  gamma/beta are pre-folded into w_ref/b_ref by
    # the wrapper, so the kernel only does the raw normalization — and only
    # once per row block: the bf16 normalized block lives in the xn scratch and
    # is reused by every column tile (column grid axis is "arbitrary").
    # x_ref: (tr, D) ; w_ref: (D, tc) bf16 ; b_ref: (1, tc) f32 ; o_ref: (tr, tc)
    @pl.when(pl.program_id(1) == 0)
    def _():
        x = x_ref[...].astype(jnp.float32)
        mean = jnp.mean(x, axis=-1, keepdims=True)
        xc = x - mean
        var = jnp.mean(xc * xc, axis=-1, keepdims=True)
        inv = jax.lax.rsqrt(var + LN_EPS)
        xn_ref[...] = (xc * inv).astype(xn_ref.dtype)      # bf16 at MXU boundary

    acc = jnp.dot(xn_ref[...], w_ref[...], preferred_element_type=jnp.float32)
    o_ref[...] = (acc + b_ref[...].astype(jnp.float32)).astype(o_ref.dtype)


def _linear_single_k_kernel(x_ref, w_ref, b_ref, o_ref):
    # Fast path: the whole K reduction fits one block -> no accumulator scratch.
    acc = jnp.dot(x_ref[...].astype(w_ref.dtype), w_ref[...],
                  preferred_element_type=jnp.float32)
    o_ref[...] = (acc + b_ref[...].astype(jnp.float32)).astype(o_ref.dtype)


def _linear_kernel(x_ref, w_ref, b_ref, o_ref, acc_ref):
    # Tiled y = x @ w + b with the K reduction on the last grid axis.
    @pl.when(pl.program_id(2) == 0)
    def _():
        acc_ref[...] = jnp.zeros_like(acc_ref)

    acc_ref[...] += jnp.dot(x_ref[...].astype(w_ref.dtype), w_ref[...],
                            preferred_element_type=jnp.float32)

    @pl.when(pl.program_id(2) == pl.num_programs(2) - 1)
    def _():
        o_ref[...] = (acc_ref[...] + b_ref[...].astype(jnp.float32)
                      ).astype(o_ref.dtype)


# ---------------------------------------------------------------------------
# Wrappers
# ---------------------------------------------------------------------------
def layernorm_pallas(x, gamma, beta, *, tile_rows=1024):
    """LayerNorm over the last axis of x (arbitrary leading shape)."""
    orig_shape = x.shape
    dim = orig_shape[-1]
    x2 = x.reshape(-1, dim)
    rows = x2.shape[0]

    tr = min(tile_rows, _round_up(rows, 8))
    # Cap: double-buffered input + output blocks must fit the VMEM budget
    # (relevant for very large D on v7x's 64 MiB VMEM).
    per_row = 4 * dim * x.dtype.itemsize
    while tr > 8 and tr * per_row > _TILE_VMEM_BUDGET:
        tr = max(8, tr // 2)
    # v7x megacore: give the parallel axis >= 2 steps when possible.
    if _cdiv(rows, tr) == 1 and rows > 8:
        tr = _round_up(_cdiv(rows, 2), 8)

    out = pl.pallas_call(
        _layernorm_kernel,
        out_shape=jax.ShapeDtypeStruct((rows, dim), x.dtype),
        grid_spec=pltpu.PrefetchScalarGridSpec(
            num_scalar_prefetch=0,
            grid=(_cdiv(rows, tr),),
            in_specs=[
                pl.BlockSpec((tr, dim), lambda i: (i, 0)),
                pl.BlockSpec((1, dim), lambda i: (0, 0)),
                pl.BlockSpec((1, dim), lambda i: (0, 0)),
            ],
            out_specs=pl.BlockSpec((tr, dim), lambda i: (i, 0)),
        ),
        compiler_params=pltpu.CompilerParams(
            dimension_semantics=("parallel",),
            vmem_limit_bytes=_VMEM_LIMIT),
    )(x2, gamma.reshape(1, dim), beta.reshape(1, dim))
    return out.reshape(orig_shape)


def prenorm_linear_pallas(x, gamma, beta, w, bias, *,
                          tile_rows=512, tile_cols=512):
    """Fused LayerNorm(x) @ w + bias (LN over the last axis of x)."""
    orig_shape = x.shape
    dim = orig_shape[-1]
    hidden = w.shape[1]
    x2 = x.reshape(-1, dim)
    rows = x2.shape[0]

    # Fold gamma/beta into the weight/bias at trace time:
    #   (xn*gamma + beta) @ W + b == xn @ (gamma[:,None]*W) + (beta @ W + b)
    # and store the folded weight bf16 for the MXU (half the W DMA bytes).
    w_f32 = w.astype(jnp.float32)
    w_eff = (gamma.astype(jnp.float32)[:, None] * w_f32).astype(jnp.bfloat16)
    b_eff = (bias.astype(jnp.float32).reshape(1, hidden)
             + beta.astype(jnp.float32) @ w_f32)

    tr = min(tile_rows, _round_up(rows, 8))
    tc = min(tile_cols, _round_up(hidden, 128))

    def fused_bytes(tr_, tc_):
        return (2 * tr_ * dim * x.dtype.itemsize      # x blocks (double-buffered)
                + tr_ * dim * 2                       # xn scratch (bf16)
                + 2 * dim * tc_ * 2                   # W blocks (bf16)
                + 2 * tr_ * tc_ * x.dtype.itemsize    # out blocks
                + 2 * tc_ * 4)                        # bias blocks

    while fused_bytes(tr, tc) > _TILE_VMEM_BUDGET and tr > 8:
        tr = max(8, tr // 2)
    while fused_bytes(tr, tc) > _TILE_VMEM_BUDGET and tc > 128:
        tc = max(128, tc // 2)
    # v7x megacore: >= 2 steps on the parallel (row) axis when possible.
    if _cdiv(rows, tr) == 1 and _cdiv(hidden, tc) == 1 and rows > 8:
        tr = _round_up(_cdiv(rows, 2), 8)

    out = pl.pallas_call(
        _prenorm_linear_kernel,
        out_shape=jax.ShapeDtypeStruct((rows, hidden), x.dtype),
        grid_spec=pltpu.PrefetchScalarGridSpec(
            num_scalar_prefetch=0,
            grid=(_cdiv(rows, tr), _cdiv(hidden, tc)),
            in_specs=[
                pl.BlockSpec((tr, dim), lambda i, j: (i, 0)),    # x rows
                pl.BlockSpec((dim, tc), lambda i, j: (0, j)),    # folded W cols
                pl.BlockSpec((1, tc), lambda i, j: (0, j)),      # folded bias
            ],
            out_specs=pl.BlockSpec((tr, tc), lambda i, j: (i, j)),
            scratch_shapes=[pltpu.VMEM((tr, dim), jnp.bfloat16)],
        ),
        compiler_params=pltpu.CompilerParams(
            # Column axis is "arbitrary": the normalized-x scratch written at
            # j == 0 must persist across all column tiles of the same row block.
            dimension_semantics=("parallel", "arbitrary"),
            vmem_limit_bytes=_VMEM_LIMIT),
    )(x2, w_eff, b_eff)
    return out.reshape(orig_shape[:-1] + (hidden,))


def _pick_k_tile(k, cap=512):
    """Largest K tile that exactly divides K (K pre-padded to a multiple of
    128).  Prefer >= 256 so the 2x256x256 MXU on v6e/v7x stays full."""
    if k <= cap:
        return k
    for cand in (512, 384, 256, 128):
        if k % cand == 0:
            return cand
    return k  # unreachable once K is a multiple of 128


def linear_pallas(x, w, b, *, tile_rows=512, tile_cols=512):
    """Standalone tiled y = x @ w + b over the last axis of x."""
    orig_shape = x.shape
    dim = orig_shape[-1]
    hidden = w.shape[1]
    x2 = x.reshape(-1, dim)
    rows = x2.shape[0]

    # Zero-pad K to a multiple of 128 so K can be tiled without masking
    # (zeros are inert in the dot); bounds the per-step W block on v7x.
    k_pad = _round_up(dim, 128)
    if k_pad != dim:
        x2 = jnp.pad(x2, ((0, 0), (0, k_pad - dim)))
        w = jnp.pad(w, ((0, k_pad - dim), (0, 0)))

    tm = min(tile_rows, _round_up(rows, 8))
    tn = min(tile_cols, _round_up(hidden, 128))
    tk = _pick_k_tile(k_pad)

    # v7x megacore: >= 2 steps on a parallel axis when possible.
    if _cdiv(rows, tm) == 1 and _cdiv(hidden, tn) == 1:
        if rows > 8:
            tm = _round_up(_cdiv(rows, 2), 8)
        elif hidden > 128:
            tn = _round_up(_cdiv(hidden, 2), 128)

    nk = _cdiv(k_pad, tk)
    bias2 = b.reshape(1, hidden)
    out_shape = jax.ShapeDtypeStruct((rows, hidden), x.dtype)

    if nk == 1:
        out = pl.pallas_call(
            _linear_single_k_kernel,
            out_shape=out_shape,
            grid_spec=pltpu.PrefetchScalarGridSpec(
                num_scalar_prefetch=0,
                grid=(_cdiv(rows, tm), _cdiv(hidden, tn)),
                in_specs=[
                    pl.BlockSpec((tm, k_pad), lambda i, j: (i, 0)),
                    pl.BlockSpec((k_pad, tn), lambda i, j: (0, j)),
                    pl.BlockSpec((1, tn), lambda i, j: (0, j)),
                ],
                out_specs=pl.BlockSpec((tm, tn), lambda i, j: (i, j)),
            ),
            compiler_params=pltpu.CompilerParams(
                dimension_semantics=("parallel", "parallel"),
                vmem_limit_bytes=_VMEM_LIMIT),
        )(x2, w, bias2)
    else:
        out = pl.pallas_call(
            _linear_kernel,
            out_shape=out_shape,
            grid_spec=pltpu.PrefetchScalarGridSpec(
                num_scalar_prefetch=0,
                grid=(_cdiv(rows, tm), _cdiv(hidden, tn), nk),
                in_specs=[
                    pl.BlockSpec((tm, tk), lambda i, j, k: (i, k)),
                    pl.BlockSpec((tk, tn), lambda i, j, k: (k, j)),
                    pl.BlockSpec((1, tn), lambda i, j, k: (0, j)),
                ],
                out_specs=pl.BlockSpec((tm, tn), lambda i, j, k: (i, j)),
                scratch_shapes=[pltpu.VMEM((tm, tn), jnp.float32)],
            ),
            compiler_params=pltpu.CompilerParams(
                dimension_semantics=("parallel", "parallel", "arbitrary"),
                vmem_limit_bytes=_VMEM_LIMIT),
        )(x2, w, bias2)
    return out.reshape(orig_shape[:-1] + (hidden,))


# ---------------------------------------------------------------------------
# Module equivalents
# ---------------------------------------------------------------------------
class PallasLinear:
    """Linear(dim, hidden) whose matmul runs as a Pallas kernel.

    Weights are stored bf16 in HBM (MXU-native on all TPU generations);
    bias and accumulation stay f32.
    """

    def __init__(self, w, b):
        self.w = w.astype(jnp.bfloat16)
        self.b = b.astype(jnp.float32)

    def __call__(self, x):
        return linear_pallas(x, self.w, self.b)


class PreNorm:
    """JAX/Pallas equivalent of the PyTorch PreNorm module."""

    def __init__(self, dim, fn):
        self.dim = dim
        self.fn = fn
        # nn.LayerNorm default init: weight=1, bias=0
        self.gamma = jnp.ones((dim,), jnp.float32)
        self.beta = jnp.zeros((dim,), jnp.float32)

    def __call__(self, x, **kwargs):
        # Fast path: fuse LayerNorm into the linear's matmul kernel (normalized
        # activation never round-trips through HBM).
        if isinstance(self.fn, PallasLinear) and not kwargs:
            return prenorm_linear_pallas(x, self.gamma, self.beta,
                                         self.fn.w, self.fn.b)
        # Generic path: LN kernel, then arbitrary fn (as in the PyTorch module).
        return self.fn(layernorm_pallas(x, self.gamma, self.beta), **kwargs)


# ---------------------------------------------------------------------------
# Demo / self-check
# ---------------------------------------------------------------------------
if __name__ == "__main__":
    B, N, D, H = 2, 16, 128, 256   # lane-dense feature dims (multiples of 128)
    key = jax.random.PRNGKey(0)
    kx, kw, kb = jax.random.split(key, 3)

    x = jax.random.normal(kx, (B, N, D), dtype=jnp.float32)
    w = jax.random.normal(kw, (D, H), dtype=jnp.float32) * 0.02
    b = jax.random.normal(kb, (H,), dtype=jnp.float32) * 0.01

    # plain-JAX reference (f32)
    mean = jnp.mean(x, axis=-1, keepdims=True)
    var = jnp.mean((x - mean) ** 2, axis=-1, keepdims=True)
    x_ln = (x - mean) * jax.lax.rsqrt(var + LN_EPS)
    ref = jnp.matmul(x_ln, w, precision=jax.lax.Precision.HIGHEST) + b

    # 1) standalone LayerNorm kernel (exact f32 LN check)
    ln_out = jax.block_until_ready(
        layernorm_pallas(x, jnp.ones((D,), jnp.float32),
                         jnp.zeros((D,), jnp.float32)))
    assert ln_out.shape == (B, N, D), ln_out.shape
    assert jnp.allclose(ln_out, x_ln, atol=1e-5, rtol=1e-5), "LN mismatch"

    # 2) fused PreNorm(Linear) path (bf16 MXU -> looser tolerance vs f32 ref)
    model = PreNorm(D, PallasLinear(w, b))
    out_fused = jax.block_until_ready(model(x))
    assert out_fused.shape == (B, N, H), out_fused.shape
    assert jnp.allclose(out_fused, ref, atol=2e-2, rtol=2e-2), "fused mismatch"

    # 3) generic-fn path (LN kernel + tiled linear kernel)
    lin = PallasLinear(w, b)
    model_generic = PreNorm(D, lambda t: lin(t))
    out_generic = jax.block_until_ready(model_generic(x))
    assert out_generic.shape == (B, N, H), out_generic.shape
    assert jnp.allclose(out_generic, ref, atol=2e-2, rtol=2e-2), \
        "generic-path mismatch"

    print("KERNEL_OK")
</pallas_src>

<mosaic_0001>
module attributes {stable_mosaic.version = 11 : i64} {
  func.func @_layernorm_kernel(%arg0: i32, %arg1: memref<16x128xf32, #tpu.memory_space<vmem>>, %arg2: memref<1x128xf32, #tpu.memory_space<vmem>>, %arg3: memref<1x128xf32, #tpu.memory_space<vmem>>, %arg4: memref<16x128xf32, #tpu.memory_space<vmem>>) attributes {dimension_semantics = [#tpu.dimension_semantics<parallel>], iteration_bounds = array<i64: 2>, scalar_prefetch = 0 : i64, scratch_operands = 0 : i64, tpu.core_type = #tpu.core_type<tc>, window_params = [{transform_indices = @transform_0, window_bounds = array<i64: 16, 128>}, {pipeline_mode = #tpu.pipeline_mode<synchronous>, transform_indices = @transform_1, window_bounds = array<i64: 1, 128>}, {pipeline_mode = #tpu.pipeline_mode<synchronous>, transform_indices = @transform_2, window_bounds = array<i64: 1, 128>}, {transform_indices = @transform_3, window_bounds = array<i64: 16, 128>}]} {
    %c0 = arith.constant 0 : index
    %c0_0 = arith.constant 0 : index
    %0 = vector.load %arg1[%c0, %c0_0] : memref<16x128xf32, #tpu.memory_space<vmem>>, vector<16x128xf32>
    %cst = arith.constant dense<0.000000e+00> : vector<16xf32>
    %1 = vector.multi_reduction <add>, %0, %cst [1] : vector<16x128xf32> to vector<16xf32>
    %2 = vector.shape_cast %1 : vector<16xf32> to vector<16x1xf32>
    %cst_1 = arith.constant 1.280000e+02 : f32
    %3 = vector.broadcast %cst_1 : f32 to vector<16x1xf32>
    %4 = arith.divf %2, %3 : vector<16x1xf32>
    %5 = vector.broadcast %4 : vector<16x1xf32> to vector<16x128xf32>
    %6 = arith.subf %0, %5 : vector<16x128xf32>
    %7 = arith.mulf %6, %6 : vector<16x128xf32>
    %cst_2 = arith.constant dense<0.000000e+00> : vector<16xf32>
    %8 = vector.multi_reduction <add>, %7, %cst_2 [1] : vector<16x128xf32> to vector<16xf32>
    %9 = vector.shape_cast %8 : vector<16xf32> to vector<16x1xf32>
    %cst_3 = arith.constant 1.280000e+02 : f32
    %10 = vector.broadcast %cst_3 : f32 to vector<16x1xf32>
    %11 = arith.divf %9, %10 : vector<16x1xf32>
    %cst_4 = arith.constant 9.99999974E-6 : f32
    %12 = vector.broadcast %cst_4 : f32 to vector<16x1xf32>
    %13 = arith.addf %11, %12 : vector<16x1xf32>
    %14 = math.rsqrt %13 : vector<16x1xf32>
    %c0_5 = arith.constant 0 : index
    %c0_6 = arith.constant 0 : index
    %15 = vector.load %arg2[%c0_5, %c0_6] : memref<1x128xf32, #tpu.memory_space<vmem>>, vector<1x128xf32>
    %c0_7 = arith.constant 0 : index
    %c0_8 = arith.constant 0 : index
    %16 = vector.load %arg3[%c0_7, %c0_8] : memref<1x128xf32, #tpu.memory_space<vmem>>, vector<1x128xf32>
    %17 = vector.broadcast %14 : vector<16x1xf32> to vector<16x128xf32>
    %18 = arith.mulf %6, %17 : vector<16x128xf32>
    %19 = vector.broadcast %15 : vector<1x128xf32> to vector<16x128xf32>
    %20 = arith.mulf %18, %19 : vector<16x128xf32>
    %21 = vector.broadcast %16 : vector<1x128xf32> to vector<16x128xf32>
    %22 = arith.addf %20, %21 : vector<16x128xf32>
    %c0_9 = arith.constant 0 : index
    %c0_10 = arith.constant 0 : index
    %23 = vector.load %arg4[%c0_9, %c0_10] : memref<16x128xf32, #tpu.memory_space<vmem>>, vector<16x128xf32>
    tpu.vector_store %arg4[%c0_9, %c0_10], %22 {strides = array<i32>} : memref<16x128xf32, #tpu.memory_space<vmem>>, vector<16x128xf32>,
    return
  }
  func.func @transform_0(%arg0: i32) -> (i32, i32) {
    %c0_i32 = arith.constant 0 : i32
    %c0_i32_0 = arith.constant 0 : i32
    return %arg0, %c0_i32 : i32, i32
  }
  func.func @transform_1(%arg0: i32) -> (i32, i32) {
    %c0_i32 = arith.constant 0 : i32
    %c0_i32_0 = arith.constant 0 : i32
    %c0_i32_1 = arith.constant 0 : i32
    return %c0_i32, %c0_i32_0 : i32, i32
  }
  func.func @transform_2(%arg0: i32) -> (i32, i32) {
    %c0_i32 = arith.constant 0 : i32
    %c0_i32_0 = arith.constant 0 : i32
    %c0_i32_1 = arith.constant 0 : i32
    return %c0_i32, %c0_i32_0 : i32, i32
  }
  func.func @transform_3(%arg0: i32) -> (i32, i32) {
    %c0_i32 = arith.constant 0 : i32
    %c0_i32_0 = arith.constant 0 : i32
    return %arg0, %c0_i32 : i32, i32
  }
}

</mosaic_0001>

<bundles_post_ra>
// kernel: tpu_custom_call.1
= control target key start
LH: loop header
LB: loop body
LE: loop exit
PB: predicated region body
PF: predicated region fallthrough
CT: control target
= control target key end

     0   :  { %8 = vsyncpa [#allocation3], 0  ;;  %s691_s0 = inlined_call_operand.hbm [shape: f32[32,128], index: 0, kind: input, shape index: {}]   ;;  %s692_s1 = inlined_call_operand.vmem [shape: f32[1,128], index: 1, kind: input, shape index: {}]   ;;  %s693_s2 = inlined_call_operand.vmem [shape: f32[1,128], index: 2, kind: input, shape index: {}]   ;;  %s694_s3 = inlined_call_operand.hbm [shape: f32[32,128], index: 3, kind: output, shape index: {}]  }
   0x1   :  { %10 = vsyncpa [#allocation3 + $0x1], 0 }
   0x2   :  { %11 = vsyncpa [#allocation4], 0 }
   0x3   :  { %13 = vsyncpa [#allocation4 + $0x1], 0  ;;  %s519_s12 = smov 0   ;;  %s521_s13 = smov 0  }
   0x4   :  { %s523_s14 = smov 0   ;;  %s525_s15 = smov 0  }
   0x5 LB: > { %s540_s16 = sadd.s32 4294967295, %s491_s15   ;;  %s323_s17 = sadd.s32 4294967294, %s491_s15   ;;  %s491_s15 = sphi %s525_s15, %s707_s15   ;;  %s487_s14 = sphi %s523_s14, %s706_s14   ;;  %s483_s13 = sphi %s521_s13, %s705_s13   ;;  %s479_s12 = sphi %s519_s12, %s704_s12  }
   0x6   : > { %s544_s18 = sadd.s32 1, %s491_s15   ;;  %s26_s19 = sadd.s32 1, %s487_s14 }
   0x7   : > { %s23_s20 = ssub.s32 %s491_s15, %s544_s18  ;;  %p33_p0 = scmp.ne.s32.totalorder %s487_s14, %s483_s13 }
   0x8   : > { %p24_p1 = scmp.eq.s32.totalorder %s23_s20, 0  ;;  %p34_p2 = scmp.eq.s32.totalorder %s491_s15, 0 }
   0x9   : > { %p39_p3 = scmp.ne.s32.totalorder %s483_s13, %s479_s12  ;;  %p40_p4 = scmp.eq.s32.totalorder %s540_s16, 0 }
   0xa   : > { %s556_s21 = scalar_select %p24_p1, %s487_s14, %s26_s19  }
   0xb   : > { %p558_p5 = por %p34_p2, %p33_p0  ;;  %p562_p6 = por %p40_p4, %p39_p3 }
   0xc   : > { %p105_p7 = scmp.eq.s32.totalorder %s540_s16, 1  ;;  %p111_p8 = scmp.eq.s32.totalorder %s323_s17, 1 }
   0xd   : > { %p353_p10 = scmp.lt.s32.totalorder %s491_s15, 2  ;;  %s137_s26 = sand.u32 1, %s487_s14  }
   0xe   : > { %p569_p11 = por %p105_p7, %p33_p0  ;;  %p573_p12 = por %p111_p8, %p39_p3 }
   0xf   : > { %s339_s27 = sshll.u32 %s491_s15, 8  ;;  %s326_s28 = sshll.u32 %s137_s26, 4 }
  0x10   : > { %s698_s24 = scalar_select %p569_p11, 1, 0 }
  0x11   : > { %s699_s25 = scalar_select %p573_p12, 1, 0 }
  0x12   : > { %s582_s4 = scalar_lea.hbm %s691_s0, %s339_s27  ;;  %s141_s5 = scalar_lea.vmem [#allocation2], %s326_s28 }
  0x13   : > { %s148_s6 = sshll.u32 %s141_s5, 4  ;;  %p586_p13 = pnand %p353_p10, %p558_p5  ;;  %s590_s6 = int_to_ptr.vmem [resolvable:$true] %s148_s6 }
  0x14   : > { %s592_s8 = scalar_lea.sflag [#allocation3], %s137_s26  ;;  %s395_s9 = scalar_lea.hbm %s582_s4, 256 }
  0x15   : > { %p396_p0 = scmp.ne.s32.totalorder %s582_s4, %s395_s9  ;;  %p397_p1 = pneg %p586_p13 }
  0x16   : > { %s400_s17 = scalar_lea.hbm %s691_s0, 512  ;;  %p401_p4 = scmp.lt.u32.totalorder %s582_s4, %s691_s0 }
  0x17   : > { %p398_p2 = pnand %p397_p1, %p396_p0  ;;  %p402_p5 = scmp.lt.u32.totalorder %s400_s17, %s395_s9 }
  0x18   : > { %p404_p8 = scmp.lt.u32.totalorder %s395_s9, %s582_s4 }
  0x19   : > { %p399_p3 = pneg %p398_p2  ;;  %p403_p7 = por %p402_p5, %p401_p4 }
  0x1b   : > { %p405_p10 = por %p404_p8, %p403_p7 }
  0x1d   : > { %p406_p9 = pnand %p405_p10, %p399_p3 }
  0x1f   : > { %409 = shalt.err (!%p406_p9)
}
  0x20   : > { %s410_s22 = scalar_lea.vmem %s590_s6, 256  ;;  %s493_s26 = smov [#allocation2]  }
  0x21   : > { %p411_p0 = scmp.ne.s32.totalorder %s590_s6, %s410_s22  ;;  %s415_s27 = sshll.u32 %s493_s26, 4  ;;  %s416_s27 = int_to_ptr.vmem [resolvable:$false] %s415_s27 }
  0x22   : > { %s417_s28 = scalar_lea.vmem %s416_s27, 512  ;;  %p418_p11 = scmp.lt.s32.totalorder %s590_s6, %s416_s27 }
  0x23   : > { %p413_p2 = pnand %p411_p0, %p397_p1  ;;  %p419_p4 = scmp.lt.s32.totalorder %s417_s28, %s410_s22 }
  0x25   : > { %p414_p12 = pneg %p413_p2  ;;  %p420_p5 = por %p419_p4, %p418_p11 }
  0x27   : > { %p421_p7 = pnand %p420_p5, %p414_p12 }
  0x29   : > { %424 = shalt.err (!%p421_p7)
}
  0x2a   : > { %s494_s29 = smov 128   ;;  %s495_s30 = smov 8  }
  0x2b   : > { %348 = dma.hbm_to_vmem [thread:$0]  (!%p586_p13), %s582_s4, 256, %s590_s6, %s592_s8, %s494_s29, %s494_s29, %s495_s30  }
  0x2c   : > { %p329_p9 = scmp.ge.s32.totalorder %s491_s15, 1  ;;  %p156_p1 = scmp.lt.s32.totalorder %s491_s15, 3 }
  0x2e   : > { %p157_p3 = pnand %p329_p9, %p156_p1 }
  0x2f   : > { %s623_s5 = sand.u32 (!%p157_p3), 1, %s483_s13  }
  0x30   : > { %160 = sbr.rel (%p157_p3) target bundleno = 387 (0x183), region = 32  ;;  %s330_s9 = sshll.u32 (!%p157_p3), %s623_s5, 4 }
  0x31   : > { %s163_s10 = scalar_lea.sflag (!%p157_p3), [#allocation3], %s623_s5  ;;  %s166_s11 = scalar_lea.vmem (!%p157_p3), [#allocation2], %s330_s9 }
  0x37   : > { %470 = dma.done.wait (%p562_p6), %s163_s10, 256  }
  0x38   : > { %472 = vsyncadd (%p562_p6), %s163_s10, 4294967040  ;;  %v191_v0 = vld [vmem:[%s166_s11] sm:$0xff]  ;;  %v192_v1 = vld [vmem:[%s166_s11 + $0x8] sm:$0xff]  ;;  %s340_s8 = sshll.u32 %s540_s16, 8  ;;  %s188_s17 = scalar_lea.vmem [#allocation5], %s330_s9 }
  0x39   : > { %193 = vadd.xlane.f32.xlu0 %v191_v0  ;;  %v332_v17 = vld [vmem:[%s692_s1] ss:$0 sm:$0xff]  ;;  %s250_s19 = sshll.u32 %s188_s17, 4  ;;  %s645_s26 = scalar_lea.hbm %s694_s3, %s340_s8  ;;  %s647_s19 = int_to_ptr.vmem [resolvable:$true] %s250_s19 }
  0x3a   : > { %v333_v19 = vld [vmem:[%s693_s2] ss:$0 sm:$0xff]  ;;  %s237_s27 = scalar_lea.sflag [#allocation4], %s623_s5  ;;  %s425_s28 = scalar_lea.vmem %s647_s19, 256 }
  0x3b   : > { %p426_p6 = scmp.ne.s32.totalorder %s647_s19, %s425_s28  ;;  %p701_p11 = scmp.ne.s32.totalorder %s698_s24, 0 }
  0x3c   : > { %s496_s16 = smov [#allocation5]  }
  0x3d   : > { %195 = vadd.xlane.f32.xlu0 %v192_v1  ;;  %p427_p12 = pnand %p426_p6, %p701_p11  ;;  %s429_s29 = sshll.u32 %s496_s16, 4  ;;  %s430_s29 = int_to_ptr.vmem [resolvable:$false] %s429_s29 }
  0x3e   : > { %s431_s30 = scalar_lea.vmem %s430_s29, 512  ;;  %p432_p8 = scmp.lt.s32.totalorder %s647_s19, %s430_s29 }
  0x3f   : > { %p428_p13 = pneg %p427_p12  ;;  %p433_p10 = scmp.lt.s32.totalorder %s431_s30, %s425_s28 }
  0x41   : > { %p434_p0 = por %p433_p10, %p432_p8 }
  0x43   : > { %p435_p2 = pnand %p434_p0, %p428_p13 }
  0xc6   : > { %v194_v2 = vpop.xlane.xlu0 %193 }
  0xc7   : > { %v198_v3 = vmul.f32 0.0078125, %v194_v2 }
  0xc9   : > { %v200_v4 = vsub.f32 %v191_v0, %v198_v3 }
  0xca   : > { %v196_v5 = vpop.xlane.xlu0 %195 }
  0xcb   : > { %v199_v6 = vmul.f32 0.0078125, %v196_v5  ;;  %v202_v7 = vmul.f32 %v200_v4, %v200_v4 }
  0xcd   : > { %v201_v8 = vsub.f32 %v192_v1, %v199_v6  ;;  %204 = vadd.xlane.f32.xlu1 %v202_v7 }
  0xcf   : > { %v203_v9 = vmul.f32 %v201_v8, %v201_v8 }
  0xd1   : > { %206 = vadd.xlane.f32.xlu1 %v203_v9 }
 0x15a   : > { %v205_v10 = vpop.xlane.xlu1 %204 }
 0x15b   : > { %v208_v11 = vmul.f32 0.0078125, %v205_v10 }
 0x15d   : > { %v210_v12 = vadd.f32 1e-05, %v208_v11 }
 0x15e   : > { %v207_v13 = vpop.xlane.xlu1 %206 }
 0x15f   : > { %391 = vrsqrt.f32 %v210_v12  ;;  %v209_v14 = vmul.f32 0.0078125, %v207_v13 }
 0x161   : > { %v211_v15 = vadd.f32 1e-05, %v209_v14 }
 0x163   : > { %393 = vrsqrt.f32 %v211_v15 }
 0x169   : > { %v392_v16 = vpop.eup %391 }
 0x16a   : > { %v216_v18 = vmul.f32 %v392_v16, %v200_v4 }
 0x16c   : > { %v224_v20 = vmul.f32 %v332_v17, %v216_v18 }
 0x16d   : > { %v394_v21 = vpop.eup %393 }
 0x16e   : > { %v232_v22 = vadd.f32 %v333_v19, %v224_v20  ;;  %v217_v23 = vmul.f32 %v394_v21, %v201_v8 }
 0x170   : > { %v225_v24 = vmul.f32 %v332_v17, %v217_v23  ;;  %234 = vst [vmem:[%s188_s17] sm:$0xff] %v232_v22 }
 0x172   : > { %v233_v25 = vadd.f32 %v333_v19, %v225_v24 }
 0x174   : > { %235 = vst [vmem:[%s188_s17 + $0x8] sm:$0xff] %v233_v25 }
 0x175   : > { %438 = shalt.err (!%p435_p2)
}
 0x176   : > { %s439_s9 = scalar_lea.hbm %s645_s26, 256  ;;  %s443_s23 = scalar_lea.hbm %s694_s3, 512 }
 0x177   : > { %p440_p4 = scmp.ne.s32.totalorder %s645_s26, %s439_s9  ;;  %p444_p9 = scmp.lt.u32.totalorder %s645_s26, %s694_s3 }
 0x178   : > { %p445_p1 = scmp.lt.u32.totalorder %s443_s23, %s439_s9  ;;  %p447_p6 = scmp.lt.u32.totalorder %s439_s9, %s645_s26 }
 0x179   : > { %p441_p5 = pnand %p440_p4, %p701_p11 }
 0x17a   : > { %p446_p3 = por %p445_p1, %p444_p9 }
 0x17b   : > { %p442_p7 = pneg %p441_p5 }
 0x17c   : > { %p448_p12 = por %p447_p6, %p446_p3 }
 0x17e   : > { %p449_p13 = pnand %p448_p12, %p442_p7 }
 0x180   : > { %452 = shalt.err (!%p449_p13)
}
 0x181   : > { %s497_s7 = smov 128   ;;  %s498_s8 = smov 8  }
 0x182   : > { %343 = dma.vmem_to_hbm [thread:$0]  (%p701_p11), %s647_s19, 256, %s645_s26, %s237_s27, %s497_s7, %s497_s7, %s498_s8  }
 0x183 PF: > { %s265_s17 = sand.u32 1, %s479_s12   ;;  %p702_p8 = scmp.ne.s32.totalorder %s699_s25, 0 }
 0x184   : > { %p703_p10 = scmp.ge.s32.totalorder %s491_s15, 2  ;;  %s266_s20 = scalar_lea.sflag [#allocation4], %s265_s17 }
 0x186   : > { %p350_p0 = pnand %p703_p10, %p702_p8 }
 0x188   : > { %474 = dma.done.wait (!%p350_p0), %s266_s20, 256  }
 0x189   : > { %476 = vsyncadd (!%p350_p0), %s266_s20, 4294967040  ;;  %p16_p2 = scmp.ge.s32.totalorder %s544_s18, 4   ;;  %s704_s12 = smov %s483_s13 }
 0x18a   : > { %s705_s13 = smov %s487_s14  ;;  %s706_s14 = smov %s556_s21 }
 0x18b   : > { %s707_s15 = smov %s544_s18  ;;  %18 = sbr.rel (!%p16_p2) target bundleno = 5 (0x5), region = 77 }
 0x192   :  { %271 = vsyncpa [#allocation3], 1 }
 0x193   :  { %273 = vsyncpa [#allocation3 + $0x1], 1 }
 0x194   :  { %274 = vsyncpa [#allocation4], 1 }
 0x195   :  { %276 = vsyncpa [#allocation4 + $0x1], 1 }

</bundles_post_ra>
